<compile_context>
chip_gen: v5e
topology: v5e:2x2
jax: 0.10.0
libtpu: 0.0.40
codegen_flags: <defaults>
</compile_context>

<pallas_src>
import functools

import jax
import jax.numpy as jnp
from jax.experimental import pallas as pl
from jax.experimental.pallas import tpu as pltpu

CE_W = 1.0
DICE_W = 1.0
BND_W = 0.1
SMOOTH = 1e-6
BIG = 1e9          # must stay >> max squared pixel distance (images up to ~15k px)


def _combined_loss_kernel(flags_ref,                 # scalar-prefetch (SMEM), int32 bitmask per q tile
                          pdata_ref,                 # (2, Np)     f32: row/col coords of p pixels
                          qdata_ref,                 # (Tq, 2+B)   f32: row, col, target per batch
                          logits_ref, target_ref,    # (B, Np)     f32
                          ce_ref, inter_ref, psum_ref, tsum_ref, bnd_ref,  # (1,1,1) each
                          min_d2_ref,                # VMEM scratch (B, Np) f32
                          *, smooth):
    k = pl.program_id(1)
    nk = pl.num_programs(1)
    big = jnp.float32(BIG)
    n_batch = min_d2_ref.shape[0]

    # ---- init running min accumulator for this p chunk ---------------------
    @pl.when(k == 0)
    def _init():
        min_d2_ref[...] = jnp.full_like(min_d2_ref, big)

    # ---- fold this q tile into the per-pixel min distance ------------------
    @pl.when(flags_ref[k] != 0)                      # skip tiles with no fg in any batch
    def _update():
        rq = qdata_ref[:, 0:1]                       # (Tq, 1)
        cq = qdata_ref[:, 1:2]                       # (Tq, 1)
        rp = pdata_ref[0:1, :]                       # (1, Np)
        cp = pdata_ref[1:2, :]                       # (1, Np)
        dr = rp - rq                                 # (Tq, Np) outer difference
        dc = cp - cq
        d2 = dr * dr + dc * dc                       # slab shared across the batch
        for i in range(n_batch):
            # per-batch gating: skip batches with no fg in this tile
            @pl.when(((flags_ref[k] >> i) & 1) != 0)
            def _upd(i=i):
                fg = qdata_ref[:, 2 + i:3 + i] > 0.5                 # (Tq, 1)
                masked = jnp.where(fg, d2, big)                      # (Tq, Np)
                tile_min = jnp.min(masked, axis=0, keepdims=True)    # (1, Np) lane-dense
                min_d2_ref[i:i + 1, :] = jnp.minimum(min_d2_ref[i:i + 1, :], tile_min)

    # ---- finalize: raw partial sums for this p chunk ------------------------
    @pl.when(k == nk - 1)
    def _finalize():
        x = logits_ref[...]                                          # (B, Np)
        t = jnp.clip(target_ref[...], 0.0, 1.0)                      # torch.clamp(target,0,1)

        # BCEWithLogitsLoss numerator (sum; normalized in the wrapper)
        bce = jnp.maximum(x, 0.0) - x * t + jnp.log1p(jnp.exp(-jnp.abs(x)))

        # sigmoid probs, clamped
        p = 1.0 / (1.0 + jnp.exp(-x))
        p = jnp.clip(p, smooth, 1.0 - smooth)

        # Boundary term: EDT stays at BIG for batches with no fg anywhere -> zero it
        d2 = min_d2_ref[...]
        dt = jnp.where(d2 < 0.5 * big, jnp.sqrt(d2), 0.0)

        ce_ref[...] = jnp.sum(bce, keepdims=True).reshape(1, 1, 1)
        inter_ref[...] = jnp.sum(p * t, keepdims=True).reshape(1, 1, 1)
        psum_ref[...] = jnp.sum(p, keepdims=True).reshape(1, 1, 1)
        tsum_ref[...] = jnp.sum(t, keepdims=True).reshape(1, 1, 1)
        bnd_ref[...] = jnp.sum(p * dt, keepdims=True).reshape(1, 1, 1)


def _vmem_capacity_bytes():
    try:
        info = pltpu.get_tpu_info()
        cap = getattr(info, "vmem_capacity_bytes", None)
        if cap:
            return int(cap)
    except Exception:
        pass
    return 64 * 1024 * 1024          # conservative (works on v5e/v6e/v7x)


def _resident_bytes(np_chunk, n_batch):
    # pdata (double-buffered) + logits/target (double-buffered) + min-d2 scratch
    return 4 * (2 * 2 * np_chunk + 2 * 2 * n_batch * np_chunk + n_batch * np_chunk)


def _pick_q_tile(n, np_chunk, n_batch, vmem_target):
    """Largest Tq (multiple of 8) whose working set fits the VMEM budget."""
    budget = vmem_target - _resident_bytes(np_chunk, n_batch) - (6 << 20)  # compiler headroom
    budget = max(budget, 1 << 20)
    # ~4 live f32 (Tq, Np) temporaries during the slab/min phase + streamed qdata
    per_row = 4 * (4 * np_chunk + 2 * (2 + n_batch))
    tq = max(8, (budget // per_row) // 8 * 8)
    n_pad8 = ((n + 7) // 8) * 8
    return int(min(tq, n_pad8))


def combined_loss(logits, target, *, q_tile=None, p_chunks=None):
    """logits, target: (B, 1, H, W) float32 (NCHW). Returns (total, dict)."""
    B, C, H, W = logits.shape
    assert C == 1, "binary segmentation: single channel expected"
    assert B <= 30, "per-batch fg flags are bit-packed into one int32"
    N = C * H * W

    lg = logits.astype(jnp.float32).reshape(B, N)
    tg = target.astype(jnp.float32).reshape(B, N)

    # pixel coordinates (flat index -> row/col)
    flat = jnp.arange(N, dtype=jnp.int32)
    rows = (flat // W).astype(jnp.float32)
    cols = (flat % W).astype(jnp.float32)
    pdata = jnp.stack([rows, cols], axis=0)                      # (2, N)

    # p (lane) axis split for megacore (2 TCs on v7x); harmless on 1-TC parts
    if p_chunks is None:
        p_chunks = 2 if (N % 256 == 0) else 1
    assert N % p_chunks == 0
    Np = N // p_chunks
    assert p_chunks == 1 or Np % 128 == 0, "p chunks must be lane-aligned"

    cap = _vmem_capacity_bytes()
    vmem_target = int(cap * 0.8)
    if q_tile is None:
        q_tile = _pick_q_tile(N, Np, B, vmem_target)
    assert q_tile % 8 == 0, "q_tile must be a multiple of 8"

    num_q = -(-N // q_tile)                                      # cdiv: pad instead of requiring N % Tq == 0
    Nq_pad = num_q * q_tile
    pad = Nq_pad - N

    # packed per-q data: [row, col, target_b0, ..., target_b{B-1}]
    tgT = tg.T                                                   # (N, B)
    qdata = jnp.concatenate([rows.reshape(N, 1), cols.reshape(N, 1), tgT], axis=1)  # (N, 2+B)
    if pad:
        qdata = jnp.pad(qdata, ((0, pad), (0, 0)))               # padded rows: target=0 -> never fg

    # per-q-tile, per-batch foreground bits (scalar prefetch)
    fg_bits = (qdata[:, 2:] > 0.5).reshape(num_q, q_tile, B).any(axis=1)   # (num_q, B)
    bit_w = jnp.asarray([1 << i for i in range(B)], dtype=jnp.int32)
    flags = jnp.sum(fg_bits.astype(jnp.int32) * bit_w[None, :], axis=1).astype(jnp.int32)

    kernel = functools.partial(_combined_loss_kernel, smooth=SMOOTH)

    grid_spec = pltpu.PrefetchScalarGridSpec(
        num_scalar_prefetch=1,
        grid=(p_chunks, num_q),
        in_specs=[
            pl.BlockSpec((2, Np), lambda p, k, flags: (0, p)),           # pdata (per p chunk)
            pl.BlockSpec((q_tile, 2 + B), lambda p, k, flags: (k, 0)),   # qdata tile
            pl.BlockSpec((B, Np), lambda p, k, flags: (0, p)),           # logits chunk (resident over k)
            pl.BlockSpec((B, Np), lambda p, k, flags: (0, p)),           # target chunk (resident over k)
        ],
        out_specs=[pl.BlockSpec((1, 1, 1), lambda p, k, flags: (p, 0, 0))] * 5,
        scratch_shapes=[pltpu.VMEM((B, Np), jnp.float32)],               # running min d^2 (per p chunk)
    )

    # VMEM budget from the real buffers, capped below physical capacity
    need = (_resident_bytes(Np, B)
            + 4 * (2 * q_tile * (2 + B) + 4 * q_tile * Np)
            + (8 << 20))
    vmem_limit = int(max(16 << 20, min(need, int(cap * 0.85))))

    outs = pl.pallas_call(
        kernel,
        out_shape=[jax.ShapeDtypeStruct((p_chunks, 1, 1), jnp.float32)] * 5,
        grid_spec=grid_spec,
        compiler_params=pltpu.CompilerParams(
            dimension_semantics=("parallel", "arbitrary"),
            vmem_limit_bytes=vmem_limit),
    )(flags, pdata, qdata, lg, tg)

    # tiny final combine of per-p-chunk partials
    ce_s, inter_s, psum_s, tsum_s, bnd_s = [jnp.sum(o) for o in outs]
    inv = 1.0 / float(B * N)
    ce = ce_s * inv
    dice = 1.0 - (2.0 * inter_s + SMOOTH) / (psum_s + tsum_s + SMOOTH)
    bnd = bnd_s * inv
    total = CE_W * ce + DICE_W * dice + BND_W * bnd
    return total, {"ce_loss": ce, "dice_loss": dice,
                   "boundary_loss": bnd, "total_loss": total}


def _reference_combined_loss(logits, target):
    """Pure-JAX reference (mirrors the PyTorch module, brute-force exact EDT)."""
    x = logits.astype(jnp.float32)
    t = jnp.clip(target.astype(jnp.float32), 0.0, 1.0)
    ce = jnp.mean(jnp.maximum(x, 0.0) - x * t + jnp.log1p(jnp.exp(-jnp.abs(x))))
    p = jnp.clip(jax.nn.sigmoid(x), SMOOTH, 1.0 - SMOOTH)
    pf, tf = p.reshape(-1), t.reshape(-1)
    inter = jnp.sum(pf * tf)
    dice = 1.0 - (2.0 * inter + SMOOTH) / (jnp.sum(pf) + jnp.sum(tf) + SMOOTH)

    B, C, H, W = target.shape
    R, Cg = jnp.meshgrid(jnp.arange(H), jnp.arange(W), indexing="ij")
    coords = jnp.stack([R.reshape(-1), Cg.reshape(-1)], -1).astype(jnp.float32)
    d2 = jnp.sum((coords[:, None, :] - coords[None, :, :]) ** 2, -1)
    dts = []
    for i in range(B):
        m = t[i, 0].reshape(-1) > 0.5
        masked = jnp.where(m[None, :], d2, jnp.inf)
        dt = jnp.sqrt(jnp.min(masked, axis=1))
        dt = jnp.where(jnp.any(m), dt, 0.0)
        dts.append(dt.reshape(H, W))
    dt_all = jnp.stack(dts)[:, None]
    bnd = jnp.mean(p * dt_all)
    total = CE_W * ce + DICE_W * dice + BND_W * bnd
    return total, ce, dice, bnd


if __name__ == "__main__":
    key = jax.random.PRNGKey(0)
    k1, k2 = jax.random.split(key)
    B, C, H, W = 2, 1, 16, 16
    logits = jax.random.normal(k1, (B, C, H, W), dtype=jnp.float32)
    target = (jax.random.uniform(k2, (B, C, H, W)) > 0.6).astype(jnp.float32)

    ref_total, ref_ce, ref_dice, ref_bnd = _reference_combined_loss(logits, target)

    # q_tile=72: exercises q-axis padding (256 -> 288), multi-tile accumulation,
    # per-batch gating and the 2-way parallel p split.  q_tile=None: auto tile.
    for qt in (72, None):
        total, parts = combined_loss(logits, target, q_tile=qt)
        total = jax.block_until_ready(total)
        assert jnp.allclose(total, ref_total, rtol=2e-4, atol=2e-4), (qt, total, ref_total)
        assert jnp.allclose(parts["ce_loss"], ref_ce, rtol=2e-4, atol=2e-4), qt
        assert jnp.allclose(parts["dice_loss"], ref_dice, rtol=2e-4, atol=2e-4), qt
        assert jnp.allclose(parts["boundary_loss"], ref_bnd, rtol=2e-4, atol=2e-4), qt

    print("KERNEL_OK")
</pallas_src>

<mosaic_0001>
module attributes {stable_mosaic.version = 11 : i64} {
  func.func @_combined_loss_kernel(%arg0: i32, %arg1: i32, %arg2: memref<4xi32, #tpu.memory_space<smem>>, %arg3: memref<2x128xf32, #tpu.memory_space<vmem>>, %arg4: memref<72x4xf32, #tpu.memory_space<vmem>>, %arg5: memref<2x128xf32, #tpu.memory_space<vmem>>, %arg6: memref<2x128xf32, #tpu.memory_space<vmem>>, %arg7: memref<1x1x1xf32, #tpu.memory_space<vmem>>, %arg8: memref<1x1x1xf32, #tpu.memory_space<vmem>>, %arg9: memref<1x1x1xf32, #tpu.memory_space<vmem>>, %arg10: memref<1x1x1xf32, #tpu.memory_space<vmem>>, %arg11: memref<1x1x1xf32, #tpu.memory_space<vmem>>, %arg12: memref<2x128xf32, #tpu.memory_space<vmem>>) attributes {dimension_semantics = [#tpu.dimension_semantics<parallel>, #tpu.dimension_semantics<arbitrary>], iteration_bounds = array<i64: 2, 4>, scalar_prefetch = 1 : i64, scratch_operands = 1 : i64, tpu.core_type = #tpu.core_type<tc>, window_params = [{transform_indices = @transform_0, window_bounds = array<i64: 2, 128>}, {transform_indices = @transform_1, window_bounds = array<i64: 72, 4>}, {transform_indices = @transform_2, window_bounds = array<i64: 2, 128>}, {transform_indices = @transform_3, window_bounds = array<i64: 2, 128>}, {transform_indices = @transform_4, window_bounds = array<i64: 1, 1, 1>}, {transform_indices = @transform_5, window_bounds = array<i64: 1, 1, 1>}, {transform_indices = @transform_6, window_bounds = array<i64: 1, 1, 1>}, {transform_indices = @transform_7, window_bounds = array<i64: 1, 1, 1>}, {transform_indices = @transform_8, window_bounds = array<i64: 1, 1, 1>}]} {
    %c0_i32 = arith.constant 0 : i32
    %0 = arith.cmpi eq, %arg1, %c0_i32 : i32
    %1 = arith.extui %0 : i1 to i32
    %cst = arith.constant 1.000000e+09 : f32
    %c0_i32_0 = arith.constant 0 : i32
    %2 = arith.cmpi ne, %1, %c0_i32_0 : i32
    scf.if %2 {
      %11 = vector.broadcast %cst : f32 to vector<2x128xf32>
      %c0 = arith.constant 0 : index
      %c0_6 = arith.constant 0 : index
      %12 = vector.load %arg12[%c0, %c0_6] : memref<2x128xf32, #tpu.memory_space<vmem>>, vector<2x128xf32>
      tpu.vector_store %arg12[%c0, %c0_6], %11 {strides = array<i32>} : memref<2x128xf32, #tpu.memory_space<vmem>>, vector<2x128xf32>,
    } else {
    }
    %3 = arith.index_cast %arg1 : i32 to index
    %4 = memref.load %arg2[%3] : memref<4xi32, #tpu.memory_space<smem>>
    %c0_i32_1 = arith.constant 0 : i32
    %5 = arith.cmpi ne, %4, %c0_i32_1 : i32
    %6 = arith.extui %5 : i1 to i32
    %cst_2 = arith.constant 1.000000e+09 : f32
    %c0_i32_3 = arith.constant 0 : i32
    %7 = arith.cmpi ne, %6, %c0_i32_3 : i32
    scf.if %7 {
      %c0 = arith.constant 0 : index
      %c0_6 = arith.constant 0 : index
      %11 = vector.load %arg4[%c0, %c0_6] : memref<72x4xf32, #tpu.memory_space<vmem>>, vector<72x1xf32>
      %c0_7 = arith.constant 0 : index
      %c1 = arith.constant 1 : index
      %12 = vector.load %arg4[%c0_7, %c1] : memref<72x4xf32, #tpu.memory_space<vmem>>, vector<72x1xf32>
      %c0_8 = arith.constant 0 : index
      %c0_9 = arith.constant 0 : index
      %13 = vector.load %arg3[%c0_8, %c0_9] : memref<2x128xf32, #tpu.memory_space<vmem>>, vector<1x128xf32>
      %c1_10 = arith.constant 1 : index
      %c0_11 = arith.constant 0 : index
      %14 = vector.load %arg3[%c1_10, %c0_11] : memref<2x128xf32, #tpu.memory_space<vmem>>, vector<1x128xf32>
      %15 = vector.broadcast %13 : vector<1x128xf32> to vector<72x128xf32>
      %16 = vector.broadcast %11 : vector<72x1xf32> to vector<72x128xf32>
      %17 = arith.subf %15, %16 : vector<72x128xf32>
      %18 = vector.broadcast %14 : vector<1x128xf32> to vector<72x128xf32>
      %19 = vector.broadcast %12 : vector<72x1xf32> to vector<72x128xf32>
      %20 = arith.subf %18, %19 : vector<72x128xf32>
      %21 = arith.mulf %17, %17 : vector<72x128xf32>
      %22 = arith.mulf %20, %20 : vector<72x128xf32>
      %23 = arith.addf %21, %22 : vector<72x128xf32>
      %24 = arith.index_cast %arg1 : i32 to index
      %25 = memref.load %arg2[%24] : memref<4xi32, #tpu.memory_space<smem>>
      %c0_i32_12 = arith.constant 0 : i32
      %26 = arith.shrsi %25, %c0_i32_12 : i32
      %c1_i32 = arith.constant 1 : i32
      %27 = arith.andi %26, %c1_i32 : i32
      %c0_i32_13 = arith.constant 0 : i32
      %28 = arith.cmpi ne, %27, %c0_i32_13 : i32
      %29 = arith.extui %28 : i1 to i32
      %c0_i32_14 = arith.constant 0 : i32
      %30 = arith.cmpi ne, %29, %c0_i32_14 : i32
      scf.if %30 {
        %c0_19 = arith.constant 0 : index
        %c2 = arith.constant 2 : index
        %38 = vector.load %arg4[%c0_19, %c2] : memref<72x4xf32, #tpu.memory_space<vmem>>, vector<72x1xf32>
        %cst_20 = arith.constant 5.000000e-01 : f32
        %39 = vector.broadcast %cst_20 : f32 to vector<72x1xf32>
        %40 = arith.cmpf ogt, %38, %39 : vector<72x1xf32>
        %41 = vector.shape_cast %40 : vector<72x1xi1> to vector<72x1xi1>
        %42 = vector.broadcast %41 : vector<72x1xi1> to vector<72x128xi1>
        %43 = vector.broadcast %cst_2 : f32 to vector<72x128xf32>
        %44 = arith.select %42, %23, %43 : vector<72x128xi1>, vector<72x128xf32>
        %cst_21 = arith.constant dense<0x7F800000> : vector<128xf32>
        %45 = vector.multi_reduction <minimumf>, %44, %cst_21 [0] : vector<72x128xf32> to vector<128xf32>
        %46 = vector.shape_cast %45 : vector<128xf32> to vector<1x128xf32>
        %c0_22 = arith.constant 0 : index
        %c0_23 = arith.constant 0 : index
        %47 = vector.load %arg12[%c0_22, %c0_23] : memref<2x128xf32, #tpu.memory_space<vmem>>, vector<1x128xf32>
        %48 = arith.minimumf %47, %46 : vector<1x128xf32>
        %c0_24 = arith.constant 0 : index
        %c0_25 = arith.constant 0 : index
        %49 = vector.load %arg12[%c0_24, %c0_25] : memref<2x128xf32, #tpu.memory_space<vmem>>, vector<1x128xf32>
        tpu.vector_store %arg12[%c0_24, %c0_25], %48 {strides = array<i32>} : memref<2x128xf32, #tpu.memory_space<vmem>>, vector<1x128xf32>,
      } else {
      }
      %31 = arith.index_cast %arg1 : i32 to index
      %32 = memref.load %arg2[%31] : memref<4xi32, #tpu.memory_space<smem>>
      %c1_i32_15 = arith.constant 1 : i32
      %33 = arith.shrsi %32, %c1_i32_15 : i32
      %c1_i32_16 = arith.constant 1 : i32
      %34 = arith.andi %33, %c1_i32_16 : i32
      %c0_i32_17 = arith.constant 0 : i32
      %35 = arith.cmpi ne, %34, %c0_i32_17 : i32
      %36 = arith.extui %35 : i1 to i32
      %c0_i32_18 = arith.constant 0 : i32
      %37 = arith.cmpi ne, %36, %c0_i32_18 : i32
      scf.if %37 {
        %c0_19 = arith.constant 0 : index
        %c3 = arith.constant 3 : index
        %38 = vector.load %arg4[%c0_19, %c3] : memref<72x4xf32, #tpu.memory_space<vmem>>, vector<72x1xf32>
        %cst_20 = arith.constant 5.000000e-01 : f32
        %39 = vector.broadcast %cst_20 : f32 to vector<72x1xf32>
        %40 = arith.cmpf ogt, %38, %39 : vector<72x1xf32>
        %41 = vector.shape_cast %40 : vector<72x1xi1> to vector<72x1xi1>
        %42 = vector.broadcast %41 : vector<72x1xi1> to vector<72x128xi1>
        %43 = vector.broadcast %cst_2 : f32 to vector<72x128xf32>
        %44 = arith.select %42, %23, %43 : vector<72x128xi1>, vector<72x128xf32>
        %cst_21 = arith.constant dense<0x7F800000> : vector<128xf32>
        %45 = vector.multi_reduction <minimumf>, %44, %cst_21 [0] : vector<72x128xf32> to vector<128xf32>
        %46 = vector.shape_cast %45 : vector<128xf32> to vector<1x128xf32>
        %c1_22 = arith.constant 1 : index
        %c0_23 = arith.constant 0 : index
        %47 = vector.load %arg12[%c1_22, %c0_23] : memref<2x128xf32, #tpu.memory_space<vmem>>, vector<1x128xf32>
        %48 = arith.minimumf %47, %46 : vector<1x128xf32>
        %c1_24 = arith.constant 1 : index
        %c0_25 = arith.constant 0 : index
        %49 = vector.load %arg12[%c1_24, %c0_25] : memref<2x128xf32, #tpu.memory_space<vmem>>, vector<1x128xf32>
        tpu.vector_store %arg12[%c1_24, %c0_25], %48 {strides = array<i32>} : memref<2x128xf32, #tpu.memory_space<vmem>>, vector<1x128xf32>,
      } else {
      }
    } else {
    }
    %c3_i32 = arith.constant 3 : i32
    %8 = arith.cmpi eq, %arg1, %c3_i32 : i32
    %9 = arith.extui %8 : i1 to i32
    %cst_4 = arith.constant 1.000000e+09 : f32
    %c0_i32_5 = arith.constant 0 : i32
    %10 = arith.cmpi ne, %9, %c0_i32_5 : i32
    scf.if %10 {
      %c0 = arith.constant 0 : index
      %c0_6 = arith.constant 0 : index
      %11 = vector.load %arg5[%c0, %c0_6] : memref<2x128xf32, #tpu.memory_space<vmem>>, vector<2x128xf32>
      %c0_7 = arith.constant 0 : index
      %c0_8 = arith.constant 0 : index
      %12 = vector.load %arg6[%c0_7, %c0_8] : memref<2x128xf32, #tpu.memory_space<vmem>>, vector<2x128xf32>
      %cst_9 = arith.constant 0.000000e+00 : f32
      %cst_10 = arith.constant 1.000000e+00 : f32
      %13 = vector.broadcast %cst_9 : f32 to vector<2x128xf32>
      %14 = arith.maximumf %13, %12 : vector<2x128xf32>
      %15 = vector.broadcast %cst_10 : f32 to vector<2x128xf32>
      %16 = arith.minimumf %15, %14 : vector<2x128xf32>
      %cst_11 = arith.constant 0.000000e+00 : f32
      %17 = vector.broadcast %cst_11 : f32 to vector<2x128xf32>
      %18 = arith.maximumf %11, %17 : vector<2x128xf32>
      %19 = arith.mulf %11, %16 : vector<2x128xf32>
      %20 = arith.subf %18, %19 : vector<2x128xf32>
      %21 = math.absf %11 : vector<2x128xf32>
      %cst_12 = arith.constant 0.000000e+00 : f32
      %22 = vector.broadcast %cst_12 : f32 to vector<2x128xf32>
      %23 = arith.subf %22, %21 : vector<2x128xf32>
      %24 = math.exp %23 : vector<2x128xf32>
      %25 = math.log1p %24 : vector<2x128xf32>
      %26 = arith.addf %20, %25 : vector<2x128xf32>
      %cst_13 = arith.constant 0.000000e+00 : f32
      %27 = vector.broadcast %cst_13 : f32 to vector<2x128xf32>
      %28 = arith.subf %27, %11 : vector<2x128xf32>
      %29 = math.exp %28 : vector<2x128xf32>
      %cst_14 = arith.constant 1.000000e+00 : f32
      %30 = vector.broadcast %cst_14 : f32 to vector<2x128xf32>
      %31 = arith.addf %30, %29 : vector<2x128xf32>
      %cst_15 = arith.constant 1.000000e+00 : f32
      %32 = vector.broadcast %cst_15 : f32 to vector<2x128xf32>
      %33 = arith.divf %32, %31 : vector<2x128xf32>
      %cst_16 = arith.constant 9.99999997E-7 : f32
      %cst_17 = arith.constant 0.999998986 : f32
      %34 = vector.broadcast %cst_16 : f32 to vector<2x128xf32>
      %35 = arith.maximumf %34, %33 : vector<2x128xf32>
      %36 = vector.broadcast %cst_17 : f32 to vector<2x128xf32>
      %37 = arith.minimumf %36, %35 : vector<2x128xf32>
      %c0_18 = arith.constant 0 : index
      %c0_19 = arith.constant 0 : index
      %38 = vector.load %arg12[%c0_18, %c0_19] : memref<2x128xf32, #tpu.memory_space<vmem>>, vector<2x128xf32>
      %cst_20 = arith.constant 5.000000e-01 : f32
      %39 = arith.mulf %cst_20, %cst_4 : f32
      %40 = vector.broadcast %39 : f32 to vector<2x128xf32>
      %41 = arith.cmpf olt, %38, %40 : vector<2x128xf32>
      %42 = math.sqrt %38 : vector<2x128xf32>
      %cst_21 = arith.constant 0.000000e+00 : f32
      %43 = vector.broadcast %cst_21 : f32 to vector<2x128xf32>
      %44 = arith.select %41, %42, %43 : vector<2x128xi1>, vector<2x128xf32>
      %45 = vector.shape_cast %26 : vector<2x128xf32> to vector<1x2x128xf32>
      %cst_22 = arith.constant dense<0.000000e+00> : vector<1xf32>
      %46 = vector.multi_reduction <add>, %45, %cst_22 [1, 2] : vector<1x2x128xf32> to vector<1xf32>
      %47 = vector.shape_cast %46 : vector<1xf32> to vector<1x1x1xf32>
      %48 = vector.extract %47[0, 0, 0] : f32 from vector<1x1x1xf32>
      %49 = vector.broadcast %48 : f32 to vector<1x1xf32>
      %50 = vector.shape_cast %49 : vector<1x1xf32> to vector<1x1x1xf32>
      %c0_23 = arith.constant 0 : index
      %c0_24 = arith.constant 0 : index
      %c0_25 = arith.constant 0 : index
      %51 = vector.load %arg7[%c0_23, %c0_24, %c0_25] : memref<1x1x1xf32, #tpu.memory_space<vmem>>, vector<1x1x1xf32>
      tpu.vector_store %arg7[%c0_23, %c0_24, %c0_25], %50 {strides = array<i32>} : memref<1x1x1xf32, #tpu.memory_space<vmem>>, vector<1x1x1xf32>,
      %52 = arith.mulf %37, %16 : vector<2x128xf32>
      %53 = vector.shape_cast %52 : vector<2x128xf32> to vector<1x2x128xf32>
      %cst_26 = arith.constant dense<0.000000e+00> : vector<1xf32>
      %54 = vector.multi_reduction <add>, %53, %cst_26 [1, 2] : vector<1x2x128xf32> to vector<1xf32>
      %55 = vector.shape_cast %54 : vector<1xf32> to vector<1x1x1xf32>
      %56 = vector.extract %55[0, 0, 0] : f32 from vector<1x1x1xf32>
      %57 = vector.broadcast %56 : f32 to vector<1x1xf32>
      %58 = vector.shape_cast %57 : vector<1x1xf32> to vector<1x1x1xf32>
      %c0_27 = arith.constant 0 : index
      %c0_28 = arith.constant 0 : index
      %c0_29 = arith.constant 0 : index
      %59 = vector.load %arg8[%c0_27, %c0_28, %c0_29] : memref<1x1x1xf32, #tpu.memory_space<vmem>>, vector<1x1x1xf32>
      tpu.vector_store %arg8[%c0_27, %c0_28, %c0_29], %58 {strides = array<i32>} : memref<1x1x1xf32, #tpu.memory_space<vmem>>, vector<1x1x1xf32>,
      %60 = vector.shape_cast %37 : vector<2x128xf32> to vector<1x2x128xf32>
      %cst_30 = arith.constant dense<0.000000e+00> : vector<1xf32>
      %61 = vector.multi_reduction <add>, %60, %cst_30 [1, 2] : vector<1x2x128xf32> to vector<1xf32>
      %62 = vector.shape_cast %61 : vector<1xf32> to vector<1x1x1xf32>
      %63 = vector.extract %62[0, 0, 0] : f32 from vector<1x1x1xf32>
      %64 = vector.broadcast %63 : f32 to vector<1x1xf32>
      %65 = vector.shape_cast %64 : vector<1x1xf32> to vector<1x1x1xf32>
      %c0_31 = arith.constant 0 : index
      %c0_32 = arith.constant 0 : index
      %c0_33 = arith.constant 0 : index
      %66 = vector.load %arg9[%c0_31, %c0_32, %c0_33] : memref<1x1x1xf32, #tpu.memory_space<vmem>>, vector<1x1x1xf32>
      tpu.vector_store %arg9[%c0_31, %c0_32, %c0_33], %65 {strides = array<i32>} : memref<1x1x1xf32, #tpu.memory_space<vmem>>, vector<1x1x1xf32>,
      %67 = vector.shape_cast %16 : vector<2x128xf32> to vector<1x2x128xf32>
      %cst_34 = arith.constant dense<0.000000e+00> : vector<1xf32>
      %68 = vector.multi_reduction <add>, %67, %cst_34 [1, 2] : vector<1x2x128xf32> to vector<1xf32>
      %69 = vector.shape_cast %68 : vector<1xf32> to vector<1x1x1xf32>
      %70 = vector.extract %69[0, 0, 0] : f32 from vector<1x1x1xf32>
      %71 = vector.broadcast %70 : f32 to vector<1x1xf32>
      %72 = vector.shape_cast %71 : vector<1x1xf32> to vector<1x1x1xf32>
      %c0_35 = arith.constant 0 : index
      %c0_36 = arith.constant 0 : index
      %c0_37 = arith.constant 0 : index
      %73 = vector.load %arg10[%c0_35, %c0_36, %c0_37] : memref<1x1x1xf32, #tpu.memory_space<vmem>>, vector<1x1x1xf32>
      tpu.vector_store %arg10[%c0_35, %c0_36, %c0_37], %72 {strides = array<i32>} : memref<1x1x1xf32, #tpu.memory_space<vmem>>, vector<1x1x1xf32>,
      %74 = arith.mulf %37, %44 : vector<2x128xf32>
      %75 = vector.shape_cast %74 : vector<2x128xf32> to vector<1x2x128xf32>
      %cst_38 = arith.constant dense<0.000000e+00> : vector<1xf32>
      %76 = vector.multi_reduction <add>, %75, %cst_38 [1, 2] : vector<1x2x128xf32> to vector<1xf32>
      %77 = vector.shape_cast %76 : vector<1xf32> to vector<1x1x1xf32>
      %78 = vector.extract %77[0, 0, 0] : f32 from vector<1x1x1xf32>
      %79 = vector.broadcast %78 : f32 to vector<1x1xf32>
      %80 = vector.shape_cast %79 : vector<1x1xf32> to vector<1x1x1xf32>
      %c0_39 = arith.constant 0 : index
      %c0_40 = arith.constant 0 : index
      %c0_41 = arith.constant 0 : index
      %81 = vector.load %arg11[%c0_39, %c0_40, %c0_41] : memref<1x1x1xf32, #tpu.memory_space<vmem>>, vector<1x1x1xf32>
      tpu.vector_store %arg11[%c0_39, %c0_40, %c0_41], %80 {strides = array<i32>} : memref<1x1x1xf32, #tpu.memory_space<vmem>>, vector<1x1x1xf32>,
    } else {
    }
    return
  }
  func.func @transform_0(%arg0: i32, %arg1: i32, %arg2: memref<4xi32, #tpu.memory_space<smem>>) -> (i32, i32) {
    %c0_i32 = arith.constant 0 : i32
    %c0_i32_0 = arith.constant 0 : i32
    return %c0_i32, %arg0 : i32, i32
  }
  func.func @transform_1(%arg0: i32, %arg1: i32, %arg2: memref<4xi32, #tpu.memory_space<smem>>) -> (i32, i32) {
    %c0_i32 = arith.constant 0 : i32
    %c0_i32_0 = arith.constant 0 : i32
    return %arg1, %c0_i32 : i32, i32
  }
  func.func @transform_2(%arg0: i32, %arg1: i32, %arg2: memref<4xi32, #tpu.memory_space<smem>>) -> (i32, i32) {
    %c0_i32 = arith.constant 0 : i32
    %c0_i32_0 = arith.constant 0 : i32
    return %c0_i32, %arg0 : i32, i32
  }
  func.func @transform_3(%arg0: i32, %arg1: i32, %arg2: memref<4xi32, #tpu.memory_space<smem>>) -> (i32, i32) {
    %c0_i32 = arith.constant 0 : i32
    %c0_i32_0 = arith.constant 0 : i32
    return %c0_i32, %arg0 : i32, i32
  }
  func.func @transform_4(%arg0: i32, %arg1: i32, %arg2: memref<4xi32, #tpu.memory_space<smem>>) -> (i32, i32, i32) {
    %c0_i32 = arith.constant 0 : i32
    %c0_i32_0 = arith.constant 0 : i32
    %c0_i32_1 = arith.constant 0 : i32
    return %arg0, %c0_i32, %c0_i32_0 : i32, i32, i32
  }
  func.func @transform_5(%arg0: i32, %arg1: i32, %arg2: memref<4xi32, #tpu.memory_space<smem>>) -> (i32, i32, i32) {
    %c0_i32 = arith.constant 0 : i32
    %c0_i32_0 = arith.constant 0 : i32
    %c0_i32_1 = arith.constant 0 : i32
    return %arg0, %c0_i32, %c0_i32_0 : i32, i32, i32
  }
  func.func @transform_6(%arg0: i32, %arg1: i32, %arg2: memref<4xi32, #tpu.memory_space<smem>>) -> (i32, i32, i32) {
    %c0_i32 = arith.constant 0 : i32
    %c0_i32_0 = arith.constant 0 : i32
    %c0_i32_1 = arith.constant 0 : i32
    return %arg0, %c0_i32, %c0_i32_0 : i32, i32, i32
  }
  func.func @transform_7(%arg0: i32, %arg1: i32, %arg2: memref<4xi32, #tpu.memory_space<smem>>) -> (i32, i32, i32) {
    %c0_i32 = arith.constant 0 : i32
    %c0_i32_0 = arith.constant 0 : i32
    %c0_i32_1 = arith.constant 0 : i32
    return %arg0, %c0_i32, %c0_i32_0 : i32, i32, i32
  }
  func.func @transform_8(%arg0: i32, %arg1: i32, %arg2: memref<4xi32, #tpu.memory_space<smem>>) -> (i32, i32, i32) {
    %c0_i32 = arith.constant 0 : i32
    %c0_i32_0 = arith.constant 0 : i32
    %c0_i32_1 = arith.constant 0 : i32
    return %arg0, %c0_i32, %c0_i32_0 : i32, i32, i32
  }
}

</mosaic_0001>

<bundles_post_ra>
// kernel: tpu_custom_call.1
= control target key start
LH: loop header
LB: loop body
LE: loop exit
PB: predicated region body
PF: predicated region fallthrough
CT: control target
= control target key end

     0   :  { %s1220_s12 = smov [#allocation4]   ;;  %s1489_s0 = inlined_call_operand.vmem [shape: s32[4], index: 0, kind: input, shape index: {}]   ;;  %s1490_s1 = inlined_call_operand.vmem [shape: f32[2,256], index: 1, kind: input, shape index: {}]   ;;  %s1491_s2 = inlined_call_operand.vmem [shape: f32[288,4], index: 2, kind: input, shape index: {}]   ;;  %s1492_s3 = inlined_call_operand.vmem [shape: f32[2,256], index: 3, kind: input, shape index: {}]   ;;  %s1493_s4 = inlined_call_operand.vmem [shape: f32[2,256], index: 4, kind: input, shape index: {}]   ;;  %s1494_s5 = inlined_call_operand.vmem [shape: f32[2,1,1], index: 5, kind: output, shape index: {0}]   ;;  %s1495_s6 = inlined_call_operand.vmem [shape: f32[2,1,1], index: 6, kind: output, shape index: {1}]   ;;  %s1496_s7 = inlined_call_operand.vmem [shape: f32[2,1,1], index: 7, kind: output, shape index: {2}]   ;;  %s1497_s8 = inlined_call_operand.vmem [shape: f32[2,1,1], index: 8, kind: output, shape index: {3}]   ;;  %s1498_s9 = inlined_call_operand.vmem [shape: f32[2,1,1], index: 9, kind: output, shape index: {4}]  }
   0x1   :  { %1500 = sst [smem:[#allocation9_spill]] %s1490_s1  ;;  %s16_s11 = sshll.u32 %s1489_s0, 4  ;;  %s17_s11 = int_to_ptr.vmem [resolvable:$true] %s16_s11 }
   0x2   :  { %19 = dma.vmem_to_smem %s17_s11, 16, %s1220_s12, [#allocation3] }
   0x3   :  { %1198 = dma.done.wait [#allocation3], 16 }
   0x4   :  { %1199 = vsyncadd [#allocation3], 4294967280 }
   0x5   :  { %22 = sfence }
   0x6   :  { %s1281_s13 = smov 0   ;;  %s1283_s14 = smov 0  }
   0x7   :  { %s1285_s15 = smov 0   ;;  %s1287_s16 = smov 0  }
   0x8   :  { %s1289_s17 = smov 0  }
   0x9 LB: > { %1501 = sst [smem:[#allocation6_spill]] %s1214_s16  ;;  %s37_s0 = sadd.s32 1, %s1210_s15  ;;  %s1218_s17 = sphi %s1289_s17, %s28_s17   ;;  %s1214_s16 = sphi %s1287_s16, %s1510_s16   ;;  %s1210_s15 = sphi %s1285_s15, %s1512_s15   ;;  %s1206_s14 = sphi %s1283_s14, %s1508_s14   ;;  %s1202_s13 = sphi %s1281_s13, %s1511_s13  }
   0xa   : > { %s40_s18 = sadd.s32 1, %s1214_s16  ;;  %p38_p0 = scmp.ge.s32.totalorder %s37_s0, 4 }
   0xb   : > { %p1072_p1 = scmp.ge.s32.totalorder %s1218_s17, 1  ;;  %p320_p2 = scmp.lt.s32.totalorder %s1218_s17, 9 }
   0xc   : > { %s1514_s0 = smov (%p38_p0, %s37_s0), 0  ;;  %s1516_s18 = smov (!%p38_p0, %s40_s18), %s1214_s16 }
   0xd   : > { %1502 = sst [smem:[#allocation7_spill]] %s1514_s0  ;;  %p321_p3 = pnand %p1072_p1, %p320_p2 }
   0xe   : > { %p42_p4 = scmp.ge.s32.totalorder %s1516_s18, 2  ;;  %p376_p5 = scmp.lt.s32.totalorder (!%p321_p3), %s1206_s14, 1 }
   0xf   : > { %324 = sbr.rel (%p321_p3) target bundleno = 771 (0x303), region = 36  ;;  %s1504_s1 = sld [smem:[#allocation9_spill]] (!%p321_p3) }
  0x10   : > { %s1518_s18 = smov (%p42_p4, %s1516_s18), 0  ;;  %s380_s19 = smul.u32 (!%p321_p3), 9, %s1202_s13 }
  0x11   : > { %1503 = sst [smem:[#allocation8_spill]] %s1518_s18  ;;  %p1077_p7 = scmp.ne.s32.totalorder (!%p321_p3), %s1202_s13, 0 }
  0x12   : > { %p381_p6 = scmp.lt.s32.totalorder (!%p321_p3), %s380_s19, 35 }
  0x14   : > { %s1520_s14 = smov (!%p376_p5, %s1206_s14), 1  ;;  %s1522_s19 = smov (!%p381_p6, %s380_s19), 35 }
  0x15   : > { %s1317_s20 = sshll.u32 %s1520_s14, 1  ;;  %s399_s22 = scalar_lea.vmem %s1495_s6, %s1520_s14 }
  0x16   : > { %s1327_s26 = scalar_lea.vmem %s1504_s1, %s1317_s20  ;;  %s1074_s18 = sshll.u32 %s1522_s19, 3 }
  0x17   : > { %s402_s24 = scalar_lea.vmem %s1496_s7, %s1520_s14  ;;  %s1348_s16 = scalar_lea.vmem %s1491_s2, %s1074_s18 }
  0x18   : > { %s405_s29 = scalar_lea.vmem %s1497_s8, %s1520_s14  ;;  %s408_s11 = scalar_lea.vmem %s1498_s9, %s1520_s14 }
  0x19   : > { %412 = sbr.rel (%p1077_p7) target bundleno = 32 (0x20), region = 40 }
  0x1e   : > { %v1221_v0 = vmov 1e+09  }
  0x1f   : > { %413 = vst [vmem:[#allocation2] sm:$0x3] %v1221_v0 }
  0x20 PF: > { %s414_s0 = sld [smem:[#allocation4 + %s1202_s13]] }
  0x26   : > { %p1078_p8 = scmp.eq.s32.totalorder %s414_s0, 0 }
  0x27   : > { %s1370_s1 = sld [smem:[#allocation4 + %s1202_s13]] (!%p1078_p8) }
  0x28   : > { %418 = sbr.rel (%p1078_p8) target bundleno = 539 (0x21b), region = 44 }
  0x2d   : > { %v423_v1 = vld [vmem:[%s1348_s16 + $0x20] sm:$0xff]  ;;  %v421_v2 = vld [vmem:[%s1348_s16 + $0x10] sm:$0xff]  ;;  %v1222_v4 = vmov 0   ;;  %v424_v5 = vld [vmem:[%s1348_s16 + $0x28] sm:$0xff]  ;;  %v1223_v11 = vmov 1   ;;  %s559_s18 = sand.u32 1, %s1370_s1 }
  0x2e   : > { %v419_v3 = vld [vmem:[%s1348_s16] sm:$0xff]  ;;  %1144 = vset.pattern.permute.xlu2 %v1222_v4  ;;  %1143 = vset.pattern.permute.xlu1 %v1222_v4  ;;  %v422_v6 = vld [vmem:[%s1348_s16 + $0x18] sm:$0xff]  ;;  %v420_v7 = vld [vmem:[%s1348_s16 + $0x8] sm:$0xff]  ;;  %p1079_p9 = scmp.eq.s32.totalorder %s559_s18, 0 }
  0x2f   : > { %1142 = vset.pattern.permute.xlu0 %v1222_v4  ;;  %453 = vperm.xlu2 %1144, %v423_v1   ;;  %v427_v8 = vld [vmem:[%s1348_s16 + $0x40] sm:$0xff]  ;;  %v426_v9 = vld [vmem:[%s1348_s16 + $0x38] sm:$0xff]  ;;  %v425_v10 = vld [vmem:[%s1348_s16 + $0x30] sm:$0xff] }
  0x30   : > { %443 = vperm.xlu1 %1143, %v421_v2   ;;  %433 = vperm.xlu0 %1142, %v419_v3   ;;  %v1148_v15 = vld [vmem:[%s1327_s26] ss:$0 sm:$0xff]  ;;  %v1149_v16 = vld [vmem:[%s1327_s26 + $0x1] ss:$0 sm:$0xff] }
  0x37   : > { %458 = vperm.xlu2 %1144, %v424_v5  }
  0x38   : > { %448 = vperm.xlu1 %1143, %v422_v6   ;;  %438 = vperm.xlu0 %1142, %v420_v7  }
  0x3f   : > { %473 = vperm.xlu2 %1144, %v427_v8  }
  0x40   : > { %468 = vperm.xlu1 %1143, %v426_v9   ;;  %463 = vperm.xlu0 %1142, %v425_v10  }
  0x47   : > { %1147 = vset.pattern.permute.xlu2 %v1223_v11 }
  0x48   : > { %1146 = vset.pattern.permute.xlu1 %v1223_v11  ;;  %1145 = vset.pattern.permute.xlu0 %v1223_v11 }
  0x49   : > { %495 = vperm.xlu2 %1147, %v421_v2   ;;  %491 = vperm.xlu1 %1146, %v420_v7  }
  0x4a   : > { %487 = vperm.xlu0 %1145, %v419_v3  }
  0x51   : > { %503 = vperm.xlu2 %1147, %v423_v1   ;;  %499 = vperm.xlu1 %1146, %v422_v6  }
  0x52   : > { %507 = vperm.xlu0 %1145, %v424_v5  }
  0x59   : > { %515 = vperm.xlu2 %1147, %v426_v9   ;;  %511 = vperm.xlu1 %1146, %v425_v10  }
  0x5a   : > { %519 = vperm.xlu0 %1145, %v427_v8  }
  0x89   : > { %v454_v12 = vpop.permute.xlu2 %453 }
  0x8a   : > { %v480_v25 = vsub.f32 %v1148_v15, %v454_v12 }
  0x8c   : > { %v535_v30 = vmul.f32 %v480_v25, %v480_v25 }
  0x91   : > { %v459_v13 = vpop.permute.xlu2 %458 }
  0x92   : > { %v481_v54 = vsub.f32 %v1148_v15, %v459_v13 }
  0x94   : > { %v536_v61 = vmul.f32 %v481_v54, %v481_v54 }
  0x99   : > { %v474_v14 = vpop.permute.xlu2 %473 }
  0x9a   : > { %v484_v2 = vsub.f32 %v1148_v15, %v474_v14 }
  0x9c   : > { %v539_v9 = vmul.f32 %v484_v2, %v484_v2 }
  0xa2   : > { %v444_v17 = vpop.permute.xlu1 %443  ;;  %v434_v18 = vpop.permute.xlu0 %433 }
  0xa3   : > { %v478_v19 = vsub.f32 %v1148_v15, %v444_v17  ;;  %v496_v20 = vpop.permute.xlu2 %495  ;;  %v476_v42 = vsub.f32 %v1148_v15, %v434_v18 }
  0xa4   : > { %v524_v21 = vsub.f32 %v1149_v16, %v496_v20 }
  0xa5   : > { %v533_v22 = vmul.f32 %v478_v19, %v478_v19  ;;  %v531_v49 = vmul.f32 %v476_v42, %v476_v42 }
  0xa6   : > { %v542_v23 = vmul.f32 %v524_v21, %v524_v21 }
  0xa8   : > { %v1375_v24 = vadd.f32 %v542_v23, %v533_v22 }
  0xaa   : > { %v449_v26 = vpop.permute.xlu1 %448  ;;  %v439_v27 = vpop.permute.xlu0 %438 }
  0xab   : > { %v504_v28 = vpop.permute.xlu2 %503  ;;  %v477_v41 = vsub.f32 %v1148_v15, %v439_v27  ;;  %v479_v53 = vsub.f32 %v1148_v15, %v449_v26 }
  0xac   : > { %v526_v29 = vsub.f32 %v1149_v16, %v504_v28 }
  0xad   : > { %v532_v47 = vmul.f32 %v477_v41, %v477_v41  ;;  %v534_v59 = vmul.f32 %v479_v53, %v479_v53 }
  0xae   : > { %v544_v31 = vmul.f32 %v526_v29, %v526_v29 }
  0xb0   : > { %v1377_v32 = vadd.f32 %v544_v31, %v535_v30 }
  0xb2   : > { %v469_v33 = vpop.permute.xlu1 %468  ;;  %v464_v34 = vpop.permute.xlu0 %463 }
  0xb3   : > { %v483_v35 = vsub.f32 %v1148_v15, %v469_v33  ;;  %v516_v36 = vpop.permute.xlu2 %515  ;;  %v482_v1 = vsub.f32 %v1148_v15, %v464_v34 }
  0xb4   : > { %v529_v37 = vsub.f32 %v1149_v16, %v516_v36 }
  0xb5   : > { %v538_v38 = vmul.f32 %v483_v35, %v483_v35  ;;  %v537_v7 = vmul.f32 %v482_v1, %v482_v1 }
  0xb6   : > { %v547_v39 = vmul.f32 %v529_v37, %v529_v37 }
  0xb8   : > { %v1379_v40 = vadd.f32 %v547_v39, %v538_v38 }
  0xbb   : > { %v492_v43 = vpop.permute.xlu1 %491 }
  0xbc   : > { %v523_v44 = vsub.f32 %v1149_v16, %v492_v43  ;;  %v488_v45 = vpop.permute.xlu0 %487 }
  0xbd   : > { %v522_v46 = vsub.f32 %v1149_v16, %v488_v45 }
  0xbe   : > { %v541_v48 = vmul.f32 %v523_v44, %v523_v44 }
  0xbf   : > { %v540_v50 = vmul.f32 %v522_v46, %v522_v46 }
  0xc0   : > { %v1381_v51 = vadd.f32 %v541_v48, %v532_v47 }
  0xc1   : > { %v1383_v52 = vadd.f32 %v540_v50, %v531_v49 }
  0xc3   : > { %v500_v55 = vpop.permute.xlu1 %499 }
  0xc4   : > { %v525_v56 = vsub.f32 %v1149_v16, %v500_v55  ;;  %v508_v57 = vpop.permute.xlu0 %507 }
  0xc5   : > { %v527_v58 = vsub.f32 %v1149_v16, %v508_v57 }
  0xc6   : > { %v543_v60 = vmul.f32 %v525_v56, %v525_v56 }
  0xc7   : > { %v545_v62 = vmul.f32 %v527_v58, %v527_v58 }
  0xc8   : > { %v1385_v63 = vadd.f32 %v543_v60, %v534_v59 }
  0xc9   : > { %v1387_v0 = vadd.f32 %v545_v62, %v536_v61 }
  0xcb   : > { %v512_v3 = vpop.permute.xlu1 %511 }
  0xcc   : > { %v528_v4 = vsub.f32 %v1149_v16, %v512_v3  ;;  %v520_v5 = vpop.permute.xlu0 %519 }
  0xcd   : > { %v530_v6 = vsub.f32 %v1149_v16, %v520_v5  ;;  %563 = sbr.rel (%p1079_p9) target bundleno = 367 (0x16f), region = 48 }
  0xce   : > { %v546_v8 = vmul.f32 %v528_v4, %v528_v4 }
  0xcf   : > { %v548_v10 = vmul.f32 %v530_v6, %v530_v6 }
  0xd0   : > { %v1389_v11 = vadd.f32 %v546_v8, %v537_v7 }
  0xd1   : > { %v1391_v12 = vadd.f32 %v548_v10, %v539_v9 }
  0xd2   : > { %v565_v13 = vld [vmem:[%s1348_s16 + $0x8] sm:$0xff]  ;;  %v564_v14 = vld [vmem:[%s1348_s16] sm:$0xff]  ;;  %v567_v15 = vld [vmem:[%s1348_s16 + $0x18] sm:$0xff]  ;;  %v1224_v16 = vmov 2   ;;  %v1225_v17 = vmov 0  }
  0xd3   : > { %1151 = vset.pattern.permute.xlu1 %v1224_v16  ;;  %1150 = vset.pattern.permute.xlu0 %v1224_v16  ;;  %vm574_vm0 = vcmp.gt.f32.partialorder %v565_v13, 0.5  ;;  %vm573_vm1 = vcmp.gt.f32.partialorder %v564_v14, 0.5  ;;  %vm576_vm2 = vcmp.gt.f32.partialorder %v567_v15, 0.5  ;;  %v566_v21 = vld [vmem:[%s1348_s16 + $0x10] sm:$0xff]  ;;  %v568_v22 = vld [vmem:[%s1348_s16 + $0x20] sm:$0xff]  ;;  %v569_v23 = vld [vmem:[%s1348_s16 + $0x28] sm:$0xff] }
  0xd4   : > { %v583_v18 = vsel %vm574_vm0, 1, %v1225_v17  ;;  %v582_v19 = vsel %vm573_vm1, 1, %v1225_v17  ;;  %1152 = vset.pattern.permute.xlu2 %v1224_v16  ;;  %v585_v20 = vsel %vm576_vm2, 1, %v1225_v17  ;;  %vm575_vm3 = vcmp.gt.f32.partialorder %v566_v21, 0.5  ;;  %v571_v28 = vld [vmem:[%s1348_s16 + $0x38] sm:$0xff]  ;;  %v570_v29 = vld [vmem:[%s1348_s16 + $0x30] sm:$0xff] }
  0xd5   : > { %595 = vperm.xlu1 %1151, %v583_v18   ;;  %592 = vperm.xlu0 %1150, %v582_v19   ;;  %vm577_vm4 = vcmp.gt.f32.partialorder %v568_v22, 0.5  ;;  %vm578_vm5 = vcmp.gt.f32.partialorder %v569_v23, 0.5  ;;  %v584_v25 = vsel %vm575_vm3, 1, %v1225_v17  ;;  %v572_v30 = vld [vmem:[%s1348_s16 + $0x40] sm:$0xff]  ;;  %vm580_vm6 = vcmp.gt.f32.partialorder %v571_v28, 0.5 }
  0xd6   : > { %601 = vperm.xlu2 %1152, %v585_v20   ;;  %v586_v26 = vsel %vm577_vm4, 1, %v1225_v17  ;;  %v587_v27 = vsel %vm578_vm5, 1, %v1225_v17  ;;  %vm579_vm7 = vcmp.gt.f32.partialorder %v570_v29, 0.5  ;;  %vm581_vm8 = vcmp.gt.f32.partialorder %v572_v30, 0.5  ;;  %v650_v7 = vld [vmem:[#allocation2] sm:$0x1] }
  0xd7   : > { %v589_v31 = vsel %vm580_vm6, 1, %v1225_v17  ;;  %v588_v33 = vsel %vm579_vm7, 1, %v1225_v17  ;;  %v590_v34 = vsel %vm581_vm8, 1, %v1225_v17 }
  0xdd   : > { %598 = vperm.xlu1 %1151, %v584_v25   ;;  %604 = vperm.xlu0 %1150, %v586_v26  }
  0xde   : > { %607 = vperm.xlu2 %1152, %v587_v27  }
  0xe5   : > { %613 = vperm.xlu1 %1151, %v589_v31   ;;  %610 = vperm.xlu0 %1150, %v588_v33  }
  0xe6   : > { %616 = vperm.xlu2 %1152, %v590_v34  }
 0x130   : > { %v602_v35 = vpop.permute.xlu2 %601 }
 0x131   : > { %vm621_vm14 = vcmp.eq.s32.totalorder %v602_v35, 1 }
 0x132   : > { %v630_v53 = vsel %vm621_vm14, %v1385_v63, 1e+09 }
 0x138   : > { %v608_v36 = vpop.permute.xlu2 %607 }
 0x139   : > { %vm623_vm11 = vcmp.eq.s32.totalorder %v608_v36, 1 }
 0x13a   : > { %v632_v46 = vsel %vm623_vm11, %v1387_v0, 1e+09 }
 0x140   : > { %v617_v42 = vpop.permute.xlu2 %616 }
 0x141   : > { %vm626_vm12 = vcmp.eq.s32.totalorder %v617_v42, 1 }
 0x142   : > { %v635_v47 = vsel %vm626_vm12, %v1391_v12, 1e+09 }
 0x147   : > { %v596_v37 = vpop.permute.xlu1 %595  ;;  %v593_v38 = vpop.permute.xlu0 %592 }
 0x148   : > { %vm618_vm9 = vcmp.eq.s32.totalorder %v593_v38, 1  ;;  %vm619_vm13 = vcmp.eq.s32.totalorder %v596_v37, 1 }
 0x149   : > { %v627_v44 = vsel %vm618_vm9, %v1383_v52, 1e+09  ;;  %v628_v48 = vsel %vm619_vm13, %v1381_v51, 1e+09 }
 0x14a   : > { %v637_v58 = vmin.f32 %v628_v48, %v632_v46 }
 0x14f   : > { %v599_v39 = vpop.permute.xlu1 %598  ;;  %v605_v41 = vpop.permute.xlu0 %604 }
 0x150   : > { %vm622_vm10 = vcmp.eq.s32.totalorder %v605_v41, 1  ;;  %vm620_vm15 = vcmp.eq.s32.totalorder %v599_v39, 1 }
 0x151   : > { %v631_v43 = vsel %vm622_vm10, %v1377_v32, 1e+09  ;;  %v629_v55 = vsel %vm620_vm15, %v1375_v24, 1e+09 }
 0x152   : > { %v636_v45 = vmin.f32 %v627_v44, %v631_v43 }
 0x154   : > { %v640_v54 = vmin.f32 %v636_v45, %v635_v47 }
 0x156   : > { %v641_v61 = vmin.f32 %v640_v54, %v637_v58 }
 0x157   : > { %v614_v49 = vpop.permute.xlu1 %613  ;;  %v611_v50 = vpop.permute.xlu0 %610 }
 0x158   : > { %vm625_vm0 = vcmp.eq.s32.totalorder %v614_v49, 1  ;;  %vm624_vm1 = vcmp.eq.s32.totalorder %v611_v50, 1 }
 0x159   : > { %v634_v56 = vsel %vm625_vm0, %v1379_v40, 1e+09  ;;  %v633_v57 = vsel %vm624_vm1, %v1389_v11, 1e+09 }
 0x15a   : > { %v639_v59 = vmin.f32 %v630_v53, %v634_v56  ;;  %v638_v60 = vmin.f32 %v629_v55, %v633_v57 }
 0x15c   : > { %v642_v62 = vmin.f32 %v638_v60, %v639_v59 }
 0x15e   : > { %v643_v1 = vmin.f32 %v641_v61, %v642_v62 }
 0x160   : > { %v644_v2 = vrot.slane %v643_v1, 4 }
 0x162   : > { %v645_v3 = vmin.f32 %v643_v1, %v644_v2 }
 0x164   : > { %v646_v4 = vrot.slane %v645_v3, 2 }
 0x166   : > { %v647_v5 = vmin.f32 %v645_v3, %v646_v4 }
 0x168   : > { %v648_v6 = vrot.slane %v647_v5, 1 }
 0x16a   : > { %v649_v8 = vmin.f32 %v647_v5, %v648_v6 }
 0x16c   : > { %v651_v9 = vmin.f32 %v650_v7, %v649_v8 }
 0x16e   : > { %652 = vst [vmem:[#allocation2] sm:$0x1] %v651_v9 }
 0x16f PF: > { %s653_s19 = sld [smem:[#allocation4 + %s1202_s13]] }
 0x175   : > { %s654_s23 = sshra.s32 %s653_s19, 1 }
 0x176   : > { %s655_s26 = sand.u32 1, %s654_s23 }
 0x177   : > { %p1080_p10 = scmp.eq.s32.totalorder %s655_s26, 0 }
 0x179   : > { %659 = sbr.rel (%p1080_p10) target bundleno = 539 (0x21b), region = 52 }
 0x17e   : > { %v661_v10 = vld [vmem:[%s1348_s16 + $0x8] sm:$0xff]  ;;  %v660_v13 = vld [vmem:[%s1348_s16] sm:$0xff]  ;;  %v663_v14 = vld [vmem:[%s1348_s16 + $0x18] sm:$0xff]  ;;  %v1226_v15 = vmov 3   ;;  %v1227_v16 = vmov 0  }
 0x17f   : > { %1154 = vset.pattern.permute.xlu1 %v1226_v15  ;;  %1153 = vset.pattern.permute.xlu0 %v1226_v15  ;;  %vm670_vm2 = vcmp.gt.f32.partialorder %v661_v10, 0.5  ;;  %vm669_vm3 = vcmp.gt.f32.partialorder %v660_v13, 0.5  ;;  %vm672_vm4 = vcmp.gt.f32.partialorder %v663_v14, 0.5  ;;  %v662_v20 = vld [vmem:[%s1348_s16 + $0x10] sm:$0xff]  ;;  %v664_v21 = vld [vmem:[%s1348_s16 + $0x20] sm:$0xff]  ;;  %v665_v22 = vld [vmem:[%s1348_s16 + $0x28] sm:$0xff] }
 0x180   : > { %v679_v17 = vsel %vm670_vm2, 1, %v1227_v16  ;;  %v678_v18 = vsel %vm669_vm3, 1, %v1227_v16  ;;  %1155 = vset.pattern.permute.xlu2 %v1226_v15  ;;  %v681_v19 = vsel %vm672_vm4, 1, %v1227_v16  ;;  %vm671_vm5 = vcmp.gt.f32.partialorder %v662_v20, 0.5  ;;  %v667_v27 = vld [vmem:[%s1348_s16 + $0x38] sm:$0xff]  ;;  %v666_v28 = vld [vmem:[%s1348_s16 + $0x30] sm:$0xff] }
 0x181   : > { %691 = vperm.xlu1 %1154, %v679_v17   ;;  %688 = vperm.xlu0 %1153, %v678_v18   ;;  %vm673_vm6 = vcmp.gt.f32.partialorder %v664_v21, 0.5  ;;  %vm674_vm7 = vcmp.gt.f32.partialorder %v665_v22, 0.5  ;;  %v680_v23 = vsel %vm671_vm5, 1, %v1227_v16  ;;  %v668_v29 = vld [vmem:[%s1348_s16 + $0x40] sm:$0xff]  ;;  %vm676_vm8 = vcmp.gt.f32.partialorder %v667_v27, 0.5 }
 0x182   : > { %697 = vperm.xlu2 %1155, %v681_v19   ;;  %v682_v25 = vsel %vm673_vm6, 1, %v1227_v16  ;;  %v683_v26 = vsel %vm674_vm7, 1, %v1227_v16  ;;  %vm675_vm9 = vcmp.gt.f32.partialorder %v666_v28, 0.5  ;;  %vm677_vm10 = vcmp.gt.f32.partialorder %v668_v29, 0.5  ;;  %v746_v62 = vld [vmem:[#allocation2 + $0x1] sm:$0x1] }
 0x183   : > { %v685_v30 = vsel %vm676_vm8, 1, %v1227_v16  ;;  %v684_v31 = vsel %vm675_vm9, 1, %v1227_v16  ;;  %v686_v33 = vsel %vm677_vm10, 1, %v1227_v16 }
 0x189   : > { %694 = vperm.xlu1 %1154, %v680_v23   ;;  %700 = vperm.xlu0 %1153, %v682_v25  }
 0x18a   : > { %703 = vperm.xlu2 %1155, %v683_v26  }
 0x191   : > { %709 = vperm.xlu1 %1154, %v685_v30   ;;  %706 = vperm.xlu0 %1153, %v684_v31  }
 0x192   : > { %712 = vperm.xlu2 %1155, %v686_v33  }
 0x1dc   : > { %v698_v34 = vpop.permute.xlu2 %697 }
 0x1dd   : > { %vm717_vm0 = vcmp.eq.s32.totalorder %v698_v34, 1 }
 0x1de   : > { %v726_v50 = vsel %vm717_vm0, %v1385_v63, 1e+09 }
 0x1e4   : > { %v704_v35 = vpop.permute.xlu2 %703 }
 0x1e5   : > { %vm719_vm13 = vcmp.eq.s32.totalorder %v704_v35, 1 }
 0x1e6   : > { %v728_v45 = vsel %vm719_vm13, %v1387_v0, 1e+09 }
 0x1ec   : > { %v713_v41 = vpop.permute.xlu2 %712 }
 0x1ed   : > { %vm722_vm14 = vcmp.eq.s32.totalorder %v713_v41, 1 }
 0x1ee   : > { %v731_v46 = vsel %vm722_vm14, %v1391_v12, 1e+09 }
 0x1f3   : > { %v692_v36 = vpop.permute.xlu1 %691  ;;  %v689_v37 = vpop.permute.xlu0 %688 }
 0x1f4   : > { %vm714_vm11 = vcmp.eq.s32.totalorder %v689_v37, 1  ;;  %vm715_vm15 = vcmp.eq.s32.totalorder %v692_v36, 1 }
 0x1f5   : > { %v723_v43 = vsel %vm714_vm11, %v1383_v52, 1e+09  ;;  %v724_v47 = vsel %vm715_vm15, %v1381_v51, 1e+09 }
 0x1f6   : > { %v733_v55 = vmin.f32 %v724_v47, %v728_v45 }
 0x1fb   : > { %v695_v38 = vpop.permute.xlu1 %694  ;;  %v701_v39 = vpop.permute.xlu0 %700 }
 0x1fc   : > { %vm718_vm12 = vcmp.eq.s32.totalorder %v701_v39, 1  ;;  %vm716_vm1 = vcmp.eq.s32.totalorder %v695_v38, 1 }
 0x1fd   : > { %v727_v42 = vsel %vm718_vm12, %v1377_v32, 1e+09  ;;  %v725_v32 = vsel %vm716_vm1, %v1375_v24, 1e+09 }
 0x1fe   : > { %v732_v44 = vmin.f32 %v723_v43, %v727_v42 }
 0x200   : > { %v736_v53 = vmin.f32 %v732_v44, %v731_v46 }
 0x202   : > { %v737_v57 = vmin.f32 %v736_v53, %v733_v55 }
 0x203   : > { %v710_v48 = vpop.permute.xlu1 %709  ;;  %v707_v49 = vpop.permute.xlu0 %706 }
 0x204   : > { %vm721_vm2 = vcmp.eq.s32.totalorder %v710_v48, 1  ;;  %vm720_vm3 = vcmp.eq.s32.totalorder %v707_v49, 1 }
 0x205   : > { %v730_v52 = vsel %vm721_vm2, %v1379_v40, 1e+09  ;;  %v729_v54 = vsel %vm720_vm3, %v1389_v11, 1e+09 }
 0x206   : > { %v735_v56 = vmin.f32 %v726_v50, %v730_v52  ;;  %v734_v0 = vmin.f32 %v725_v32, %v729_v54 }
 0x208   : > { %v738_v12 = vmin.f32 %v734_v0, %v735_v56 }
 0x20a   : > { %v739_v58 = vmin.f32 %v737_v57, %v738_v12 }
 0x20c   : > { %v740_v51 = vrot.slane %v739_v58, 4 }
 0x20e   : > { %v741_v59 = vmin.f32 %v739_v58, %v740_v51 }
 0x210   : > { %v742_v60 = vrot.slane %v741_v59, 2 }
 0x212   : > { %v743_v61 = vmin.f32 %v741_v59, %v742_v60 }
 0x214   : > { %v744_v63 = vrot.slane %v743_v61, 1 }
 0x216   : > { %v745_v1 = vmin.f32 %v743_v61, %v744_v63 }
 0x218   : > { %v747_v2 = vmin.f32 %v746_v62, %v745_v1 }
 0x21a   : > { %748 = vst [vmem:[#allocation2 + $0x1] sm:$0x1] %v747_v2 }
 0x21b PF: > { %p1081_p11 = scmp.ne.s32.totalorder %s1202_s13, 3 }
 0x21c   : > { %s1505_s21 = scalar_lea.vmem (!%p1081_p11), %s1492_s3, %s1317_s20  ;;  %s1506_s13 = scalar_lea.vmem (!%p1081_p11), %s1493_s4, %s1317_s20 }
 0x21d   : > { %752 = sbr.rel (%p1081_p11) target bundleno = 771 (0x303), region = 56  ;;  %s1507_s10 = scalar_lea.vmem (!%p1081_p11), %s1494_s5, %s1520_s14 }
 0x222   : > { %v753_v24 = vld [vmem:[%s1505_s21] sm:$0x3]  ;;  %vm810_vm8 = vcmask 1041408   ;;  %vm822_vm13 = vcmask 0  }
 0x223   : > { %v760_v40 = vand.u32 2147483647, %v753_v24  ;;  %v774_v11 = vsub.f32 0.0, %v753_v24  ;;  %v795_v3 = vld [vmem:[#allocation2] sm:$0x3]  ;;  %v757_v21 = vmax.f32 %v753_v24, 0.0 }
 0x224   : > { %1156 = vrsqrt.f32 %v795_v3  ;;  %v754_v7 = vld [vmem:[%s1506_s13] sm:$0x3]  ;;  %vm804_vm4 = vcmp.eq.f32.partialorder %v795_v3, inf  ;;  %v807_v42 = vand.u32 2147483648, %v795_v3  ;;  %vm806_vm10 = vcmp.eq.f32.partialorder %v795_v3, 0.0 }
 0x225   : > { %v761_v4 = vsub.f32 0.0, %v760_v40  ;;  %v775_v5 = vmul.f32 1.442695, %v774_v11  ;;  %v755_v8 = vmax.f32 %v754_v7, 0.0  ;;  %vm796_vm12 = vcmp.lt.f32.partialorder %v795_v3, 5e+08 }
 0x227   : > { %v762_v6 = vmul.f32 1.442695, %v761_v4  ;;  %1158 = vpow2.f32 %v775_v5  ;;  %v756_v16 = vmin.f32 %v755_v8, 1.0 }
 0x229   : > { %1160 = vpow2.f32 %v762_v6  ;;  %v758_v22 = vmul.f32 %v756_v16, %v753_v24  ;;  %v849_v12 = vsel %vm810_vm8, %v756_v16, 0.0 }
 0x22a   : > { %v1157_v9 = vpop.eup %1156 }
 0x22b   : > { %v798_v13 = vmul.f32 %v1157_v9, %v795_v3  ;;  %v759_v29 = vsub.f32 %v757_v21, %v758_v22 }
 0x22d   : > { %v1159_v10 = vpop.eup %1158  ;;  %v799_v17 = vmul.f32 %v1157_v9, %v798_v13 }
 0x22e   : > { %v777_v14 = vadd.f32 1.0, %v1159_v10 }
 0x22f   : > { %v1161_v15 = vpop.eup %1160  ;;  %v800_v20 = vmul.f32 0.5, %v799_v17 }
 0x230   : > { %v764_v18 = vadd.f32 1.0, %v1161_v15  ;;  %v767_v19 = vmul.f32 -0.5, %v1161_v15  ;;  %1162 = vrcp.f32 %v777_v14  ;;  %v770_v26 = vand.u32 2147483647, %v1161_v15 }
 0x231   : > { %v801_v25 = vsub.f32 1.5, %v800_v20  ;;  %vm783_vm6 = vweird.f32 %v777_v14  ;;  %v789_v34 = vand.u32 2147483648, %v777_v14  ;;  %v787_v38 = vand.u32 2147483647, %v777_v14 }
 0x232   : > { %1164 = vlog2.f32 %v764_v18  ;;  %v768_v23 = vadd.f32 1.0, %v767_v19  ;;  %vm771_vm5 = vcmp.lt.f32.partialorder %v770_v26, 0.0004427343 }
 0x233   : > { %v802_v27 = vmul.f32 %v1157_v9, %v801_v25  ;;  %v790_v44 = vor.u32 1.1754944e-38, %v789_v34  ;;  %vm788_vm11 = vcmp.eq.f32.partialorder %v787_v38, 8.507059e+37 }
 0x234   : > { %v769_v30 = vmul.f32 %v1161_v15, %v768_v23 }
 0x235   : > { %v803_v35 = vmul.f32 %v802_v27, %v795_v3 }
 0x236   : > { %v1163_v28 = vpop.eup %1162 }
 0x237   : > { %v779_v31 = vmul.f32 %v1163_v28, %v777_v14  ;;  %vm784_vm7 = vweird.f32 %v1163_v28  ;;  %v805_v45 = vsel %vm804_vm4, %v795_v3, %v803_v35 }
 0x238   : > { %v1165_v33 = vpop.eup %1164  ;;  %vm785_vm9 = vmor %vm783_vm6, %vm784_vm7  ;;  %v808_v49 = vsel %vm806_vm10, %v807_v42, %v805_v45 }
 0x239   : > { %v766_v36 = vmul.f32 0.6931472, %v1165_v33  ;;  %v780_v37 = vsub.f32 1.0, %v779_v31  ;;  %v809_v32 = vsel %vm796_vm12, %v808_v49, 0.0 }
 0x23b   : > { %v772_v39 = vsel %vm771_vm5, %v769_v30, %v766_v36  ;;  %v781_v41 = vmul.f32 %v1163_v28, %v780_v37 }
 0x23c   : > { %v773_v43 = vadd.f32 %v772_v39, %v759_v29 }
 0x23d   : > { %v782_v46 = vadd.f32 %v1163_v28, %v781_v41 }
 0x23e   : > { %v811_v47 = vsel %vm810_vm8, %v773_v43, 0.0 }
 0x23f   : > { %812 = vadd.xlane.f32.xlu0 %v811_v47  ;;  %v786_v48 = vsel %vm785_vm9, %v1163_v28, %v782_v46 }
 0x240   : > { %v791_v50 = vsel %vm788_vm11, %v790_v44, %v786_v48 }
 0x241   : > { %v793_v53 = vmax.f32 %v791_v50, 1e-06 }
 0x243   : > { %v794_v52 = vmin.f32 %v793_v53, 0.999999 }
 0x245   : > { %v837_v54 = vsel %vm810_vm8, %v794_v52, 0.0  ;;  %v861_v55 = vmul.f32 %v809_v32, %v794_v52  ;;  %v824_v56 = vmul.f32 %v794_v52, %v756_v16 }
 0x246   : > { %838 = vadd.xlane.f32.xlu1 %v837_v54 }
 0x247   : > { %v862_v0 = vsel %vm810_vm8, %v861_v55, 0.0  ;;  %v825_v57 = vsel %vm810_vm8, %v824_v56, 0.0 }
 0x248   : > { %863 = vadd.xlane.f32.xlu2 %v862_v0  ;;  %826 = vadd.xlane.f32.xlu0 %v825_v57 }
 0x24e   : > { %850 = vadd.xlane.f32.xlu1 %v849_v12 }
 0x2b2   : > { %v813_v58 = vpop.xlane.xlu0 %812 }
 0x2b3   : > { %v814_v51 = vrot.slane %v813_v58, 4 }
 0x2b5   : > { %v815_v59 = vadd.f32 %v814_v51, %v813_v58 }
 0x2b7   : > { %v816_v60 = vrot.slane %v815_v59, 2 }
 0x2b9   : > { %v839_v61 = vpop.xlane.xlu1 %838  ;;  %v817_v63 = vadd.f32 %v816_v60, %v815_v59 }
 0x2ba   : > { %v840_v62 = vrot.slane %v839_v61, 4 }
 0x2bb   : > { %v864_v1 = vpop.xlane.xlu2 %863  ;;  %v827_v2 = vpop.xlane.xlu0 %826  ;;  %v818_v24 = vrot.slane %v817_v63, 1 }
 0x2bc   : > { %v841_v40 = vadd.f32 %v840_v62, %v839_v61  ;;  %v865_v11 = vrot.slane %v864_v1, 4  ;;  %v828_v3 = vrot.slane %v827_v2, 4 }
 0x2bd   : > { %v819_v4 = vadd.f32 %v818_v24, %v817_v63 }
 0x2be   : > { %v842_v5 = vrot.slane %v841_v40, 2  ;;  %v866_v6 = vadd.f32 %v865_v11, %v864_v1  ;;  %v829_v7 = vadd.f32 %v828_v3, %v827_v2 }
 0x2bf   : > { %1084 = vpush %v819_v4 }
 0x2c0   : > { %v830_v8 = vrot.slane %v829_v7, 2  ;;  %v843_v9 = vadd.f32 %v842_v5, %v841_v40  ;;  %v867_v10 = vrot.slane %v866_v6, 2 }
 0x2c1   : > { %v851_v13 = vpop.xlane.xlu1 %850 }
 0x2c2   : > { %v831_v14 = vadd.f32 %v830_v8, %v829_v7  ;;  %v852_v15 = vrot.slane %v851_v13, 4  ;;  %v844_v16 = vrot.slane %v843_v9, 1  ;;  %v868_v19 = vadd.f32 %v867_v10, %v866_v6 }
 0x2c4   : > { %v853_v17 = vadd.f32 %v852_v15, %v851_v13  ;;  %v832_v18 = vrot.slane %v831_v14, 1  ;;  %v845_v22 = vadd.f32 %v844_v16, %v843_v9  ;;  %v869_v25 = vrot.slane %v868_v19, 1 }
 0x2c6   : > { %v854_v20 = vrot.slane %v853_v17, 2  ;;  %v833_v21 = vadd.f32 %v832_v18, %v831_v14  ;;  %v870_v28 = vadd.f32 %v869_v25, %v868_v19 }
 0x2c8   : > { %v855_v23 = vadd.f32 %v854_v20, %v853_v17  ;;  %1086 = vpush %v833_v21 }
 0x2c9   : > { %1088 = vpush %v845_v22 }
 0x2ca   : > { %v856_v26 = vrot.slane %v855_v23, 1 }
 0x2cc   : > { %v857_v27 = vadd.f32 %v856_v26, %v855_v23 }
 0x2ce   : > { %1090 = vpush %v857_v27 }
 0x2cf   : > { %1092 = vpush %v870_v28 }
 0x2f0   : > { %s1085_s20 = spop %1084 }
 0x2f1   : > { %v821_v29 = vstv %s1085_s20 }
 0x2f2   : > { %823 = vst.msk [vmem:[%s1507_s10] sm:$0x1] %vm822_vm13, %v821_v29 }
 0x2f9   : > { %s1087_s0 = spop %1086 }
 0x2fa   : > { %v835_v30 = vstv %s1087_s0  ;;  %s1089_s1 = spop %1088 }
 0x2fb   : > { %836 = vst.msk [vmem:[%s399_s22] sm:$0x1] %vm822_vm13, %v835_v30  ;;  %v847_v31 = vstv %s1089_s1 }
 0x2fc   : > { %848 = vst.msk [vmem:[%s402_s24] sm:$0x1] %vm822_vm13, %v847_v31 }
 0x2ff   : > { %s1091_s16 = spop %1090 }
 0x300   : > { %v859_v33 = vstv %s1091_s16  ;;  %s1093_s12 = spop %1092 }
 0x301   : > { %860 = vst.msk [vmem:[%s405_s29] sm:$0x1] %vm822_vm13, %v859_v33  ;;  %v872_v34 = vstv %s1093_s12 }
 0x302   : > { %873 = vst.msk [vmem:[%s408_s11] sm:$0x1] %vm822_vm13, %v872_v34 }
 0x303 PF: > { %s28_s17 = sadd.s32 1, %s1218_s17   ;;  %s1508_s14 = sld [smem:[#allocation6_spill]] }
 0x304   : > { %p25_p12 = scmp.ge.s32.totalorder %s28_s17, 10   ;;  %s1509_s22 = sld [smem:[#allocation7_spill]] }
 0x305   : > { %s1510_s16 = sld [smem:[#allocation8_spill]]  ;;  %s1511_s13 = smov %s1210_s15 }
 0x306   :  { %27 = sbr.rel (!%p25_p12) target bundleno = 9 (0x9), region = 143 }
 0x30a   : > { %s1512_s15 = smov %s1509_s22 }

</bundles_post_ra>
